<compile_context>
chip_gen: v7x
topology: tpu7x:2x2x1
jax: 0.10.0
libtpu: 0.0.40
codegen_flags: <defaults>
</compile_context>

<pallas_src>
import functools
import math

import jax
import jax.numpy as jnp
import numpy as np
from jax import lax
from jax.experimental import pallas as pl
from jax.experimental.pallas import tpu as pltpu


def _slru_kernel(x_ref, wi_ref, bi_ref, wo_ref, bo_ref, decay_ref, gamma_ref,
                 pow_ref, pos_ref, o_ref, carry_ref, *scan_bufs,
                 n_levels, multi_chunk, use_slice_levels):
    rows = x_ref.shape[0]

    # Input projection for the whole packed block: one lane-dense MXU matmul.
    # NOTE: padded time rows are NOT zero after this (they receive bi); that is fine
    # because information only flows toward larger t and those rows are sliced off.
    u = jnp.dot(x_ref[...], wi_ref[...], preferred_element_type=jnp.float32)
    h = u + bi_ref[...]                                   # (rows, Wu) f32

    coef = decay_ref[...]                                 # (1, Wu): a^(2^level), starts at a
    pos = pos_ref[...]                                    # (rows, 1): time index within segment

    in_ref = False
    cur = nxt = None
    shift = 1
    for _ in range(n_levels):
        if use_slice_levels and shift >= 8:
            # Sublane-aligned levels: offset loads + multiply-add on ping-pong scratch,
            # no XLU rotate, no compare+select.  Only used when K == 1 (single segment).
            if not in_ref:
                cur, nxt = scan_bufs
                cur[...] = h
                in_ref = True
            d = rows - shift
            nxt[pl.ds(shift, d), :] = (cur[pl.ds(shift, d), :]
                                       + coef * cur[pl.ds(0, d), :])
            nxt[pl.ds(0, shift), :] = cur[pl.ds(0, shift), :]
            cur, nxt = nxt, cur
        else:
            # Masked-roll level: roll (XLU slot) + per-segment mask (VPU).
            rolled = pltpu.roll(h, shift=shift, axis=0)
            h = h + coef * jnp.where(pos >= shift, rolled, 0.0)
        coef = coef * coef
        shift *= 2
    if in_ref:
        h = cur[...]

    if multi_chunk:
        # Cross-chunk carry: h_t += a^(t_local+1) * h_prev_chunk_last.
        t = pl.program_id(1)

        @pl.when(t == 0)
        def _reset():
            carry_ref[...] = jnp.zeros_like(carry_ref)

        h = h + pow_ref[...] * carry_ref[...]
        carry_ref[...] = h[rows - 1:rows, :]

    # Output projection: lane-dense MXU matmul + lane-dense store.
    y = (h * gamma_ref[...]).astype(wo_ref.dtype)
    out = jnp.dot(y, wo_ref[...], preferred_element_type=jnp.float32) + bo_ref[...]
    o_ref[...] = out.astype(o_ref.dtype)


def _default_lane_target():
    # v6e / v7x have a 2x256^2 MXU -> pack 256 lanes; keep 128 on v2..v5.
    try:
        kind = jax.devices()[0].device_kind.lower()
    except Exception:
        return 128
    for tag in ("v2", "v3", "v4", "v5"):
        if tag in kind:
            return 128
    return 256


def slru_forward(x, wi, bi, wo, bo, params_log, *,
                 mxu_dtype=jnp.bfloat16,
                 lane_target=None,
                 chunk_rows=512,
                 rows_target=512,
                 min_parallel_blocks=2):
    """SLRU forward.

    x: (B, L, H); wi: (U, H) [i_dense.weight]; bi: (U,); wo: (H, U) [o_dense.weight];
    bo: (H,); params_log: (2, U).  Returns (B, L, H) in x.dtype.
    """
    B, L, H = x.shape
    U = wi.shape[0]
    out_dtype = x.dtype
    if lane_target is None:
        lane_target = _default_lane_target()

    # ---- batch lane-packing factor -------------------------------------------------
    base_tile = max(1, min(lane_target, 128) // U)
    B_tile = max(1, lane_target // U)
    B_tile = min(B_tile, B)
    # Keep >= min_parallel_blocks batch blocks on the "parallel" axis when possible
    # (v7x has 2 TensorCores); otherwise fall back toward 128-lane packing.
    while (B_tile > base_tile and B_tile % 2 == 0
           and -(-B // B_tile) < min_parallel_blocks):
        B_tile //= 2
    n_blocks = -(-B // B_tile)

    # ---- time chunking ---------------------------------------------------------------
    Ls = max(8, ((L + 7) // 8) * 8)                 # sublane-aligned sequence length
    C = min(Ls, max(8, (chunk_rows // 8) * 8))      # chunk rows (multiple of 8)
    n_chunks = -(-L // C)
    Lp = n_chunks * C
    # Scan depth derived from the chunk length C, so every chunk is fully covered.
    n_levels = int(math.ceil(math.log2(C))) if C > 1 else 0
    multi_chunk = n_chunks > 1

    # ---- sublane stacking (only when no cross-chunk carry is needed) -----------------
    if n_chunks == 1:
        K = min(n_blocks, max(1, rows_target // C))
        while K > 1 and -(-n_blocks // K) < min_parallel_blocks:
            K = max(1, K // 2)
    else:
        K = 1
    n_blocks_p = -(-n_blocks // K) * K
    grid_b = n_blocks_p // K
    Bp = n_blocks_p * B_tile
    rows = K * C

    Wh = B_tile * H
    Wu = B_tile * U
    use_slice_levels = (K == 1) and (n_levels > 3)

    # ---- pack batches into lanes (no f32 up-cast; bf16 halves this copy) -------------
    # TODO(synk): do this relayout in VMEM inside the kernel to avoid the HBM round trip.
    xq = x.astype(mxu_dtype)
    xq = jnp.pad(xq, ((0, Bp - B), (0, Lp - L), (0, 0)))
    xq = xq.reshape(n_blocks_p, B_tile, Lp, H).transpose(0, 2, 1, 3).reshape(n_blocks_p, Lp, Wh)
    # Fold K stacked lane-blocks into the row axis (pure metadata reshape).
    xq = xq.reshape(grid_b, K * Lp, Wh)

    # ---- block-diagonal weights: one matmul covers all B_tile batches ----------------
    wi_t = wi.T.astype(jnp.float32)                          # (H, U)
    wo_t = wo.T.astype(jnp.float32)                          # (U, H)
    eye = jnp.eye(B_tile, dtype=jnp.float32)
    wi_bd = jnp.einsum("ab,hu->ahbu", eye, wi_t).reshape(Wh, Wu).astype(mxu_dtype)
    wo_bd = jnp.einsum("ab,uh->aubh", eye, wo_t).reshape(Wu, Wh).astype(mxu_dtype)
    bi_t = jnp.tile(bi.reshape(1, U).astype(jnp.float32), (1, B_tile))      # (1, Wu)
    bo_t = jnp.tile(bo.reshape(1, H).astype(jnp.float32), (1, B_tile))      # (1, Wh)

    params = jnp.exp(params_log.astype(jnp.float32))
    nu, gamma = params[0], params[1]
    decay_row = jnp.tile(jnp.exp(-nu).reshape(1, U), (1, B_tile))           # (1, Wu)
    gamma_row = jnp.tile(gamma.reshape(1, U), (1, B_tile))                  # (1, Wu)
    nu_row = jnp.tile(nu.reshape(1, U), (1, B_tile))                        # (1, Wu)

    pos_col = jnp.tile(jnp.arange(C, dtype=jnp.int32), (K,)).reshape(rows, 1)
    powers = jnp.exp(-(pos_col.astype(jnp.float32) + 1.0) * nu_row)         # (rows, Wu)

    # ---- VMEM budget (explicit scoped limit, with headroom) --------------------------
    esz = jnp.dtype(mxu_dtype).itemsize
    eso = jnp.dtype(out_dtype).itemsize
    need = (2 * rows * Wh * (esz + eso)                 # x / out double-buffered blocks
            + 2 * 2 * Wh * Wu * esz                     # block-diag weights (dbl-buffered)
            + 4 * rows * Wu * 4                         # powers / pos / small constants
            + (1 + (2 * rows if use_slice_levels else 0)) * Wu * 4   # carry + ping-pong
            + 8 * rows * max(Wu, Wh) * 4)               # value temporaries
    vmem_limit = int(min(48 * 2 ** 20, max(32 * 2 ** 20, 2 * need)))

    kernel = functools.partial(
        _slru_kernel,
        n_levels=n_levels,
        multi_chunk=multi_chunk,
        use_slice_levels=use_slice_levels,
    )

    scratch = [pltpu.VMEM((1, Wu), jnp.float32)]            # cross-chunk carry
    if use_slice_levels:
        scratch += [pltpu.VMEM((rows, Wu), jnp.float32),    # ping-pong scan slabs
                    pltpu.VMEM((rows, Wu), jnp.float32)]

    const = lambda b, t: (0, 0)
    out_packed = pl.pallas_call(
        kernel,
        out_shape=jax.ShapeDtypeStruct((grid_b, n_chunks * rows, Wh), out_dtype),
        grid_spec=pltpu.PrefetchScalarGridSpec(
            num_scalar_prefetch=0,
            grid=(grid_b, n_chunks),
            in_specs=[
                pl.BlockSpec((None, rows, Wh), lambda b, t: (b, t, 0)),   # packed x block
                pl.BlockSpec((Wh, Wu), const),                            # blockdiag(Wi^T)
                pl.BlockSpec((1, Wu), const),                             # bi (tiled)
                pl.BlockSpec((Wu, Wh), const),                            # blockdiag(Wo^T)
                pl.BlockSpec((1, Wh), const),                             # bo (tiled)
                pl.BlockSpec((1, Wu), const),                             # exp(-nu) (tiled)
                pl.BlockSpec((1, Wu), const),                             # gamma (tiled)
                pl.BlockSpec((rows, Wu), const),                          # carry decay powers
                pl.BlockSpec((rows, 1), const),                           # per-segment time idx
            ],
            out_specs=pl.BlockSpec((None, rows, Wh), lambda b, t: (b, t, 0)),
            scratch_shapes=scratch,
        ),
        compiler_params=pltpu.CompilerParams(
            dimension_semantics=("parallel", "arbitrary"),
            vmem_limit_bytes=vmem_limit,
        ),
    )(xq, wi_bd, bi_t, wo_bd, bo_t, decay_row, gamma_row, powers, pos_col)

    # Unpack lanes back to (B, L, H) and drop padding.
    out = out_packed.reshape(n_blocks_p, Lp, Wh)
    out = out.reshape(n_blocks_p, Lp, B_tile, H).transpose(0, 2, 1, 3).reshape(Bp, Lp, H)
    return out[:B, :L]


def slru_reference(x, wi, bi, wo, bo, params_log):
    """Pure-JAX replica of the PyTorch SLRU.forward (verification only)."""
    B, L, H = x.shape
    U = wi.shape[0]
    hi = jax.lax.Precision.HIGHEST
    u = jnp.einsum("blh,uh->blu", x, wi, precision=hi) + bi
    params = jnp.exp(params_log)
    nu, gamma = params[0], params[1]
    log2_L = int(math.ceil(math.log2(L))) if L > 1 else 0
    L_pad = 2 ** log2_L
    xc = jnp.pad(u, ((0, 0), (0, L_pad - L), (0, 0)))
    for i in range(1, log2_L + 1):
        l = 2 ** i
        x3 = xc.reshape(B * L_pad // l, l, U)
        x1, x2 = x3[:, : l // 2], x3[:, l // 2:]
        pos = jnp.arange(1, l // 2 + 1, dtype=jnp.float32)
        lambs = jnp.exp(-jnp.outer(pos, nu))
        x2 = x2 + lambs * x1[:, -1:]
        xc = jnp.concatenate([x1, x2], axis=1).reshape(B, L_pad, U)
    y = xc[:, :L] * gamma
    return jnp.einsum("blu,hu->blh", y, wo, precision=hi) + bo


if __name__ == "__main__":
    # Small shapes consistent with the module: hidden=32, units=32.
    B, L, H, U = 16, 6, 32, 32

    key = jax.random.PRNGKey(0)
    k1, k2, k3, k4, k5, k6, k7 = jax.random.split(key, 7)

    # Deterministic parameter init (shapes match nn.Linear / params_log of the module).
    bound_i = 1.0 / math.sqrt(H)
    wi = jax.random.uniform(k1, (U, H), jnp.float32, -bound_i, bound_i)   # i_dense.weight
    bi = jax.random.uniform(k2, (U,), jnp.float32, -bound_i, bound_i)     # i_dense.bias
    bound_o = 1.0 / math.sqrt(U)
    wo = jax.random.uniform(k3, (H, U), jnp.float32, -bound_o, bound_o)   # o_dense.weight
    bo = jax.random.uniform(k4, (H,), jnp.float32, -bound_o, bound_o)     # o_dense.bias

    r_min, r_max = 0.9, 0.999
    uu = jax.random.uniform(k5, (U,), jnp.float32)
    nu_log = jnp.log(-0.5 * jnp.log(uu * (r_max ** 2 - r_min ** 2) + r_min ** 2))
    gamma_log = jnp.log(jnp.sqrt(1.0 - jnp.exp(-jnp.exp(nu_log)) ** 2))
    params_log = jnp.stack([nu_log, gamma_log])                            # (2, U)

    x = jax.random.normal(k6, (B, L, H), jnp.float32)
    ref = slru_reference(x, wi, bi, wo, bo, params_log)
    ref = jax.block_until_ready(ref)

    # 1) f32 MXU path: lane-packed (128) + sublane-stacked segments (K > 1), 1 chunk.
    out = slru_forward(x, wi, bi, wo, bo, params_log,
                       mxu_dtype=jnp.float32, lane_target=128)
    out = jax.block_until_ready(out)
    assert out.shape == (B, L, H) and out.dtype == jnp.float32
    np.testing.assert_allclose(np.asarray(out), np.asarray(ref), rtol=2e-3, atol=2e-3)

    # 2) Time-chunked path: cross-chunk carried state + aligned-slice scan levels.
    B2, L2 = 4, 50
    x2 = jax.random.normal(k7, (B2, L2, H), jnp.float32)
    out2 = slru_forward(x2, wi, bi, wo, bo, params_log,
                        mxu_dtype=jnp.float32, lane_target=128, chunk_rows=16)
    out2 = jax.block_until_ready(out2)
    ref2 = slru_reference(x2, wi, bi, wo, bo, params_log)
    np.testing.assert_allclose(np.asarray(out2), np.asarray(ref2), rtol=2e-3, atol=2e-3)

    # 3) bf16 MXU operands (default) with device-default lane packing; looser tolerance
    #    because the decay recurrence amplifies projection rounding error.
    out3 = slru_forward(x, wi, bi, wo, bo, params_log)
    out3 = jax.block_until_ready(out3)
    np.testing.assert_allclose(np.asarray(out3), np.asarray(ref), rtol=5e-2, atol=5e-2)

    print("KERNEL_OK")
</pallas_src>

<mosaic_0001>
module attributes {stable_mosaic.version = 11 : i64} {
  func.func @_slru_kernel(%arg0: i32, %arg1: i32, %arg2: memref<1x16x128xf32, #tpu.memory_space<vmem>>, %arg3: memref<128x128xf32, #tpu.memory_space<vmem>>, %arg4: memref<1x128xf32, #tpu.memory_space<vmem>>, %arg5: memref<128x128xf32, #tpu.memory_space<vmem>>, %arg6: memref<1x128xf32, #tpu.memory_space<vmem>>, %arg7: memref<1x128xf32, #tpu.memory_space<vmem>>, %arg8: memref<1x128xf32, #tpu.memory_space<vmem>>, %arg9: memref<16x128xf32, #tpu.memory_space<vmem>>, %arg10: memref<16x1xi32, #tpu.memory_space<vmem>>, %arg11: memref<1x16x128xf32, #tpu.memory_space<vmem>>, %arg12: memref<1x128xf32, #tpu.memory_space<vmem>>) attributes {dimension_semantics = [#tpu.dimension_semantics<parallel>, #tpu.dimension_semantics<arbitrary>], iteration_bounds = array<i64: 2, 1>, scalar_prefetch = 0 : i64, scratch_operands = 1 : i64, tpu.core_type = #tpu.core_type<tc>, window_params = [{transform_indices = @transform_0, window_bounds = array<i64: 1, 16, 128>}, {pipeline_mode = #tpu.pipeline_mode<synchronous>, transform_indices = @transform_1, window_bounds = array<i64: 128, 128>}, {pipeline_mode = #tpu.pipeline_mode<synchronous>, transform_indices = @transform_2, window_bounds = array<i64: 1, 128>}, {pipeline_mode = #tpu.pipeline_mode<synchronous>, transform_indices = @transform_3, window_bounds = array<i64: 128, 128>}, {pipeline_mode = #tpu.pipeline_mode<synchronous>, transform_indices = @transform_4, window_bounds = array<i64: 1, 128>}, {pipeline_mode = #tpu.pipeline_mode<synchronous>, transform_indices = @transform_5, window_bounds = array<i64: 1, 128>}, {pipeline_mode = #tpu.pipeline_mode<synchronous>, transform_indices = @transform_6, window_bounds = array<i64: 1, 128>}, {pipeline_mode = #tpu.pipeline_mode<synchronous>, transform_indices = @transform_7, window_bounds = array<i64: 16, 128>}, {pipeline_mode = #tpu.pipeline_mode<synchronous>, transform_indices = @transform_8, window_bounds = array<i64: 16, 1>}, {transform_indices = @transform_9, window_bounds = array<i64: 1, 16, 128>}]} {
    %c0 = arith.constant 0 : index
    %c0_0 = arith.constant 0 : index
    %c0_1 = arith.constant 0 : index
    %0 = vector.load %arg2[%c0, %c0_0, %c0_1] : memref<1x16x128xf32, #tpu.memory_space<vmem>>, vector<1x16x128xf32>
    %1 = vector.shape_cast %0 : vector<1x16x128xf32> to vector<16x128xf32>
    %c0_2 = arith.constant 0 : index
    %c0_3 = arith.constant 0 : index
    %2 = vector.load %arg3[%c0_2, %c0_3] : memref<128x128xf32, #tpu.memory_space<vmem>>, vector<128x128xf32>
    %cst = arith.constant dense<0.000000e+00> : vector<16x128xf32>
    %3 = tpu.matmul %1, %2, %cst {dimension_numbers = #tpu.dot_dimension_numbers<[1], [0], [0], [1], [0, 0, 1, 1], [], []>} : vector<16x128xf32>, vector<128x128xf32>, vector<16x128xf32> -> vector<16x128xf32>
    %c0_4 = arith.constant 0 : index
    %c0_5 = arith.constant 0 : index
    %4 = vector.load %arg4[%c0_4, %c0_5] : memref<1x128xf32, #tpu.memory_space<vmem>>, vector<1x128xf32>
    %5 = vector.broadcast %4 : vector<1x128xf32> to vector<16x128xf32>
    %6 = arith.addf %3, %5 : vector<16x128xf32>
    %c0_6 = arith.constant 0 : index
    %c0_7 = arith.constant 0 : index
    %7 = vector.load %arg7[%c0_6, %c0_7] : memref<1x128xf32, #tpu.memory_space<vmem>>, vector<1x128xf32>
    %c0_8 = arith.constant 0 : index
    %c0_9 = arith.constant 0 : index
    %8 = vector.load %arg10[%c0_8, %c0_9] : memref<16x1xi32, #tpu.memory_space<vmem>>, vector<16x1xi32>
    %c1_i32 = arith.constant 1 : i32
    %9 = tpu.dynamic_rotate %6 by %c1_i32 dim 0 : vector<16x128xf32>, i32 -> vector<16x128xf32>
    %c1_i32_10 = arith.constant 1 : i32
    %10 = vector.broadcast %c1_i32_10 : i32 to vector<16x1xi32>
    %11 = arith.cmpi sge, %8, %10 : vector<16x1xi32>
    %cst_11 = arith.constant 0.000000e+00 : f32
    %12 = vector.shape_cast %11 : vector<16x1xi1> to vector<16x1xi1>
    %13 = vector.broadcast %12 : vector<16x1xi1> to vector<16x128xi1>
    %14 = vector.broadcast %cst_11 : f32 to vector<16x128xf32>
    %15 = arith.select %13, %9, %14 : vector<16x128xi1>, vector<16x128xf32>
    %16 = vector.broadcast %7 : vector<1x128xf32> to vector<16x128xf32>
    %17 = arith.mulf %16, %15 : vector<16x128xf32>
    %18 = arith.addf %6, %17 : vector<16x128xf32>
    %19 = arith.mulf %7, %7 : vector<1x128xf32>
    %c2_i32 = arith.constant 2 : i32
    %20 = tpu.dynamic_rotate %18 by %c2_i32 dim 0 : vector<16x128xf32>, i32 -> vector<16x128xf32>
    %c2_i32_12 = arith.constant 2 : i32
    %21 = vector.broadcast %c2_i32_12 : i32 to vector<16x1xi32>
    %22 = arith.cmpi sge, %8, %21 : vector<16x1xi32>
    %cst_13 = arith.constant 0.000000e+00 : f32
    %23 = vector.shape_cast %22 : vector<16x1xi1> to vector<16x1xi1>
    %24 = vector.broadcast %23 : vector<16x1xi1> to vector<16x128xi1>
    %25 = vector.broadcast %cst_13 : f32 to vector<16x128xf32>
    %26 = arith.select %24, %20, %25 : vector<16x128xi1>, vector<16x128xf32>
    %27 = vector.broadcast %19 : vector<1x128xf32> to vector<16x128xf32>
    %28 = arith.mulf %27, %26 : vector<16x128xf32>
    %29 = arith.addf %18, %28 : vector<16x128xf32>
    %30 = arith.mulf %19, %19 : vector<1x128xf32>
    %c4_i32 = arith.constant 4 : i32
    %31 = tpu.dynamic_rotate %29 by %c4_i32 dim 0 : vector<16x128xf32>, i32 -> vector<16x128xf32>
    %c4_i32_14 = arith.constant 4 : i32
    %32 = vector.broadcast %c4_i32_14 : i32 to vector<16x1xi32>
    %33 = arith.cmpi sge, %8, %32 : vector<16x1xi32>
    %cst_15 = arith.constant 0.000000e+00 : f32
    %34 = vector.shape_cast %33 : vector<16x1xi1> to vector<16x1xi1>
    %35 = vector.broadcast %34 : vector<16x1xi1> to vector<16x128xi1>
    %36 = vector.broadcast %cst_15 : f32 to vector<16x128xf32>
    %37 = arith.select %35, %31, %36 : vector<16x128xi1>, vector<16x128xf32>
    %38 = vector.broadcast %30 : vector<1x128xf32> to vector<16x128xf32>
    %39 = arith.mulf %38, %37 : vector<16x128xf32>
    %40 = arith.addf %29, %39 : vector<16x128xf32>
    %c0_16 = arith.constant 0 : index
    %c0_17 = arith.constant 0 : index
    %41 = vector.load %arg8[%c0_16, %c0_17] : memref<1x128xf32, #tpu.memory_space<vmem>>, vector<1x128xf32>
    %42 = vector.broadcast %41 : vector<1x128xf32> to vector<16x128xf32>
    %43 = arith.mulf %40, %42 : vector<16x128xf32>
    %c0_18 = arith.constant 0 : index
    %c0_19 = arith.constant 0 : index
    %44 = vector.load %arg5[%c0_18, %c0_19] : memref<128x128xf32, #tpu.memory_space<vmem>>, vector<128x128xf32>
    %cst_20 = arith.constant dense<0.000000e+00> : vector<16x128xf32>
    %45 = tpu.matmul %43, %44, %cst_20 {dimension_numbers = #tpu.dot_dimension_numbers<[1], [0], [0], [1], [0, 0, 1, 1], [], []>} : vector<16x128xf32>, vector<128x128xf32>, vector<16x128xf32> -> vector<16x128xf32>
    %c0_21 = arith.constant 0 : index
    %c0_22 = arith.constant 0 : index
    %46 = vector.load %arg6[%c0_21, %c0_22] : memref<1x128xf32, #tpu.memory_space<vmem>>, vector<1x128xf32>
    %47 = vector.broadcast %46 : vector<1x128xf32> to vector<16x128xf32>
    %48 = arith.addf %45, %47 : vector<16x128xf32>
    %c0_23 = arith.constant 0 : index
    %c0_24 = arith.constant 0 : index
    %c0_25 = arith.constant 0 : index
    %49 = vector.load %arg11[%c0_23, %c0_24, %c0_25] : memref<1x16x128xf32, #tpu.memory_space<vmem>>, vector<1x16x128xf32>
    %50 = vector.shape_cast %49 : vector<1x16x128xf32> to vector<16x128xf32>
    %51 = vector.shape_cast %48 : vector<16x128xf32> to vector<1x16x128xf32>
    tpu.vector_store %arg11[%c0_23, %c0_24, %c0_25], %51 {strides = array<i32>} : memref<1x16x128xf32, #tpu.memory_space<vmem>>, vector<1x16x128xf32>,
    return
  }
  func.func @transform_0(%arg0: i32, %arg1: i32) -> (i32, i32, i32) {
    %c0_i32 = arith.constant 0 : i32
    %c0_i32_0 = arith.constant 0 : i32
    return %arg0, %arg1, %c0_i32 : i32, i32, i32
  }
  func.func @transform_1(%arg0: i32, %arg1: i32) -> (i32, i32) {
    %c0_i32 = arith.constant 0 : i32
    %c0_i32_0 = arith.constant 0 : i32
    %c0_i32_1 = arith.constant 0 : i32
    return %c0_i32, %c0_i32_0 : i32, i32
  }
  func.func @transform_2(%arg0: i32, %arg1: i32) -> (i32, i32) {
    %c0_i32 = arith.constant 0 : i32
    %c0_i32_0 = arith.constant 0 : i32
    %c0_i32_1 = arith.constant 0 : i32
    return %c0_i32, %c0_i32_0 : i32, i32
  }
  func.func @transform_3(%arg0: i32, %arg1: i32) -> (i32, i32) {
    %c0_i32 = arith.constant 0 : i32
    %c0_i32_0 = arith.constant 0 : i32
    %c0_i32_1 = arith.constant 0 : i32
    return %c0_i32, %c0_i32_0 : i32, i32
  }
  func.func @transform_4(%arg0: i32, %arg1: i32) -> (i32, i32) {
    %c0_i32 = arith.constant 0 : i32
    %c0_i32_0 = arith.constant 0 : i32
    %c0_i32_1 = arith.constant 0 : i32
    return %c0_i32, %c0_i32_0 : i32, i32
  }
  func.func @transform_5(%arg0: i32, %arg1: i32) -> (i32, i32) {
    %c0_i32 = arith.constant 0 : i32
    %c0_i32_0 = arith.constant 0 : i32
    %c0_i32_1 = arith.constant 0 : i32
    return %c0_i32, %c0_i32_0 : i32, i32
  }
  func.func @transform_6(%arg0: i32, %arg1: i32) -> (i32, i32) {
    %c0_i32 = arith.constant 0 : i32
    %c0_i32_0 = arith.constant 0 : i32
    %c0_i32_1 = arith.constant 0 : i32
    return %c0_i32, %c0_i32_0 : i32, i32
  }
  func.func @transform_7(%arg0: i32, %arg1: i32) -> (i32, i32) {
    %c0_i32 = arith.constant 0 : i32
    %c0_i32_0 = arith.constant 0 : i32
    %c0_i32_1 = arith.constant 0 : i32
    return %c0_i32, %c0_i32_0 : i32, i32
  }
  func.func @transform_8(%arg0: i32, %arg1: i32) -> (i32, i32) {
    %c0_i32 = arith.constant 0 : i32
    %c0_i32_0 = arith.constant 0 : i32
    %c0_i32_1 = arith.constant 0 : i32
    return %c0_i32, %c0_i32_0 : i32, i32
  }
  func.func @transform_9(%arg0: i32, %arg1: i32) -> (i32, i32, i32) {
    %c0_i32 = arith.constant 0 : i32
    %c0_i32_0 = arith.constant 0 : i32
    return %arg0, %arg1, %c0_i32 : i32, i32, i32
  }
}

</mosaic_0001>

<bundles_post_ra>
// kernel: tpu_custom_call.1
= control target key start
LH: loop header
LB: loop body
LE: loop exit
PB: predicated region body
PF: predicated region fallthrough
CT: control target
= control target key end

     0   :  { %s1632_s0 = inlined_call_operand.hbm [shape: f32[2,16,128], index: 0, kind: input, shape index: {}]   ;;  %s1633_s1 = inlined_call_operand.hbm [shape: f32[128,128], index: 1, kind: input, shape index: {}]   ;;  %s1634_s2 = inlined_call_operand.vmem [shape: f32[1,128], index: 2, kind: input, shape index: {}]   ;;  %s1635_s3 = inlined_call_operand.hbm [shape: f32[128,128], index: 3, kind: input, shape index: {}]   ;;  %s1636_s4 = inlined_call_operand.vmem [shape: f32[1,128], index: 4, kind: input, shape index: {}]   ;;  %s1637_s5 = inlined_call_operand.vmem [shape: f32[1,128], index: 5, kind: input, shape index: {}]   ;;  %s1638_s6 = inlined_call_operand.vmem [shape: f32[1,128], index: 6, kind: input, shape index: {}]   ;;  %s1639_s7 = inlined_call_operand.vmem [shape: f32[16,128], index: 7, kind: input, shape index: {}]   ;;  %s1640_s8 = inlined_call_operand.vmem [shape: s32[16,1], index: 8, kind: input, shape index: {}]   ;;  %s1641_s9 = inlined_call_operand.hbm [shape: f32[2,16,128], index: 9, kind: output, shape index: {}]  }
   0x1   :  { %1650 = sst [smem:[#allocation15_spill]] %s1641_s9 }
   0x2   :  { %14 = vsyncpa [#allocation4], 0 }
   0x3   :  { %16 = vsyncpa [#allocation4 + $0x1], 0 }
   0x4   :  { %17 = vsyncpa [#allocation7], 0 }
   0x5   :  { %18 = vsyncpa [#allocation5], 0 }
   0x6   :  { %20 = vsyncpa [#allocation5 + $0x1], 0  ;;  %s1342_s30 = smov 0   ;;  %s1344_s10 = smov 0  }
   0x7   :  { %s1346_s11 = smov 0   ;;  %s1348_s12 = smov 0  }
   0x8   :  { %s1350_s7 = smov 0   ;;  %s1352_s13 = smov 0  }
   0x9 LB: > { %1651 = sst [smem:[#allocation13_spill]] %s1261_s30  ;;  %s825_s14 = sadd.s32 4294967295, %s1281_s13   ;;  %s1281_s13 = sphi %s1352_s13, %s26_s13   ;;  %s1277_s7 = sphi %s1350_s7, %s1674_s7   ;;  %s1273_s12 = sphi %s1348_s12, %s1673_s12   ;;  %s1269_s11 = sphi %s1346_s11, %s1672_s11   ;;  %s1265_s10 = sphi %s1344_s10, %s1671_s10   ;;  %s1261_s30 = sphi %s1342_s30, %s1670_s30  }
   0xa   : > { %s826_s15 = sadd.s32 4294967294, %s1281_s13   ;;  %p60_p0 = scmp.ne.s32.totalorder %s1265_s10, %s1261_s30 }
   0xb   : > { %p1376_p1 = scmp.eq.s32.totalorder %s825_s14, 0  ;;  %p1380_p2 = scmp.eq.s32.totalorder %s825_s14, 1 }
   0xc   : > { %p260_p3 = scmp.eq.s32.totalorder %s826_s15, 1  ;;  %p827_p5 = scmp.ge.s32.totalorder %s1281_s13, 1 }
   0xd   : > { %s1652_s16 = scalar_select %p1376_p1, 1, 0 }
   0xe   : > { %p1386_p4 = por %p1376_p1, %p60_p0  ;;  %p1391_p6 = por %p260_p3, %p60_p0 }
   0xf   : > { %p267_p7 = scmp.lt.s32.totalorder %s1281_s13, 3  ;;  %s1283_s21 = smov [#allocation6]  }
  0x10   : > { %s1654_s18 = scalar_select %p1386_p4, 1, 0 }
  0x11   : > { %s1655_s19 = scalar_select %p1391_p6, 1, 0 }
  0x12   : > { %p1396_p8 = pnand %p827_p5, %p267_p7  ;;  %s279_s22 = sshll.u32 %s1283_s21, 4  ;;  %s1400_s22 = int_to_ptr.vmem [resolvable:$true] %s279_s22 }
  0x13   : > { %1656 = sst [smem:[#allocation14_spill]] %s1655_s19  ;;  %s1284_s24 = smov [#allocation8]  }
  0x14   : > { %p1031_p9 = pneg %p1396_p8  ;;  %s295_s25 = sshll.u32 %s1284_s24, 4  ;;  %s1411_s25 = int_to_ptr.vmem [resolvable:$true] %s295_s25 }
  0x15   : > { %s1109_s28 = scalar_lea.hbm %s1633_s1, 2048 }
  0x16   : > { %p1407_p11 = pnand %p1031_p9, %p1376_p1  ;;  %p1110_p12 = scmp.ne.s32.totalorder %s1633_s1, %s1109_s28 }
  0x17   : > { %p1116_p5 = scmp.lt.u32.totalorder %s1109_s28, %s1633_s1 }
  0x18   : > { %p1111_p13 = pneg %p1407_p11 }
  0x1a   : > { %p1112_p0 = pnand %p1111_p13, %p1110_p12 }
  0x1c   : > { %p1113_p3 = pneg %p1112_p0 }
  0x1e   : > { %p1118_p7 = pnand %p1116_p5, %p1113_p3 }
  0x20   : > { %1121 = shalt.err (!%p1118_p7)
}
  0x21   : > { %s1122_s24 = scalar_lea.vmem %s1400_s22, 2048  ;;  %p1130_p1 = scmp.lt.s32.totalorder %s1400_s22, %s1400_s22 }
  0x22   : > { %p1123_p9 = scmp.ne.s32.totalorder %s1400_s22, %s1122_s24  ;;  %p1131_p12 = scmp.lt.s32.totalorder %s1122_s24, %s1122_s24 }
  0x24   : > { %p1125_p10 = pnand %p1123_p9, %p1111_p13  ;;  %p1132_p0 = por %p1131_p12, %p1130_p1 }
  0x26   : > { %p1126_p6 = pneg %p1125_p10 }
  0x28   : > { %p1133_p4 = pnand %p1132_p0, %p1126_p6 }
  0x2a   : > { %1136 = shalt.err (!%p1133_p4)
}
  0x2b   : > { %s1648_s26 = smov 128   ;;  %s1286_s27 = smov 8  }
  0x2c   : > { %1034 = dma.hbm_to_vmem [thread:$0]  (!%p1407_p11), %s1633_s1, 2048, %s1400_s22, [#allocation7], %s1648_s26, %s1648_s26, %s1286_s27  }
  0x2d   : > { %s1137_s21 = scalar_lea.hbm %s1635_s3, 2048 }
  0x2e   : > { %p1138_p1 = scmp.ne.s32.totalorder %s1635_s3, %s1137_s21  ;;  %p1144_p10 = scmp.lt.u32.totalorder %s1137_s21, %s1635_s3 }
  0x30   : > { %p1140_p4 = pnand %p1138_p1, %p1111_p13 }
  0x32   : > { %p1141_p6 = pneg %p1140_p4 }
  0x34   : > { %p1146_p3 = pnand %p1144_p10, %p1141_p6 }
  0x36   : > { %1149 = shalt.err (!%p1146_p3)
}
  0x37   : > { %s1150_s22 = scalar_lea.vmem %s1411_s25, 2048  ;;  %p1158_p12 = scmp.lt.s32.totalorder %s1411_s25, %s1411_s25 }
  0x38   : > { %p1151_p5 = scmp.ne.s32.totalorder %s1411_s25, %s1150_s22  ;;  %p1159_p0 = scmp.lt.s32.totalorder %s1150_s22, %s1150_s22 }
  0x3a   : > { %p1153_p7 = pnand %p1151_p5, %p1111_p13  ;;  %p1160_p1 = por %p1159_p0, %p1158_p12 }
  0x3c   : > { %p1154_p9 = pneg %p1153_p7 }
  0x3e   : > { %p1161_p4 = pnand %p1160_p1, %p1154_p9 }
  0x40   : > { %1164 = shalt.err (!%p1161_p4)
}
  0x41   : > { %1037 = dma.hbm_to_vmem [thread:$0]  (!%p1407_p11), %s1635_s3, 2048, %s1411_s25, [#allocation7], %s1648_s26, %s1648_s26, %s1286_s27  }
  0x42   : > { %s38_s19 = sadd.s32 1, %s1277_s7  ;;  %s47_s23 = sadd.s32 1, %s1269_s11 }
  0x43   : > { %p40_p13 = scmp.ge.s32.totalorder %s38_s19, 2  ;;  %p54_p6 = scmp.ne.s32.totalorder %s1269_s11, %s1265_s10 }
  0x44   : > { %p55_p10 = scmp.eq.s32.totalorder %s1281_s13, 0  ;;  %p1048_p3 = scmp.lt.s32.totalorder %s1281_s13, 2 }
  0x45   : > { %s1676_s19 = smov (%p40_p13, %s38_s19), 0  ;;  %p1481_p7 = por %p1380_p2, %p54_p6 }
  0x46   : > { %p56_p5 = por %p55_p10, %p54_p6  ;;  %s42_s29 = ssub.s32 %s1277_s7, %s1676_s19 }
  0x47   : > { %s1659_s28 = scalar_select %p1481_p7, 1, 0 }
  0x48   : > { %s324_s14 = sand.u32 1, %s1269_s11   ;;  %p45_p9 = scmp.eq.s32.totalorder %s42_s29, 0 }
  0x49   : > { %s831_s25 = sshll.u32 %s324_s14, 4  ;;  %s847_s15 = sshll.u32 %s1277_s7, 8 }
  0x4a   : > { %s1490_s21 = scalar_select %p45_p9, %s1269_s11, %s47_s23  }
  0x4b   : > { %s1495_s9 = scalar_lea.hbm %s1632_s0, %s847_s15  ;;  %s328_s17 = scalar_lea.vmem [#allocation3], %s831_s25 }
  0x4c   : > { %s337_s30 = sshll.u32 %s328_s17, 4  ;;  %p1499_p2 = pnand %p1048_p3, %p56_p5  ;;  %s1503_s30 = int_to_ptr.vmem [resolvable:$true] %s337_s30 }
  0x4d   : > { %s1505_s23 = scalar_lea.sflag [#allocation4], %s324_s14  ;;  %s1165_s29 = scalar_lea.hbm %s1495_s9, 256 }
  0x4e   : > { %p1166_p11 = scmp.ne.s32.totalorder %s1495_s9, %s1165_s29  ;;  %p1167_p12 = pneg %p1499_p2 }
  0x4f   : > { %s1170_s24 = scalar_lea.hbm %s1632_s0, 512  ;;  %p1171_p4 = scmp.lt.u32.totalorder %s1495_s9, %s1632_s0 }
  0x50   : > { %p1168_p0 = pnand %p1167_p12, %p1166_p11  ;;  %p1172_p13 = scmp.lt.u32.totalorder %s1170_s24, %s1165_s29 }
  0x51   : > { %p1174_p10 = scmp.lt.u32.totalorder %s1165_s29, %s1495_s9 }
  0x52   : > { %p1169_p1 = pneg %p1168_p0  ;;  %p1173_p6 = por %p1172_p13, %p1171_p4 }
  0x54   : > { %p1175_p3 = por %p1174_p10, %p1173_p6 }
  0x56   : > { %p1176_p5 = pnand %p1175_p3, %p1169_p1 }
  0x58   : > { %1179 = shalt.err (!%p1176_p5)
}
  0x59   : > { %s1180_s14 = scalar_lea.vmem %s1503_s30, 256  ;;  %s1287_s25 = smov [#allocation3]  }
  0x5a   : > { %p1181_p9 = scmp.ne.s32.totalorder %s1503_s30, %s1180_s14  ;;  %s1185_s15 = sshll.u32 %s1287_s25, 4  ;;  %s1186_s15 = int_to_ptr.vmem [resolvable:$false] %s1185_s15 }
  0x5b   : > { %s1187_s22 = scalar_lea.vmem %s1186_s15, 512  ;;  %p1188_p7 = scmp.lt.s32.totalorder %s1503_s30, %s1186_s15 }
  0x5c   : > { %p1183_p11 = pnand %p1181_p9, %p1167_p12  ;;  %p1189_p4 = scmp.lt.s32.totalorder %s1187_s22, %s1180_s14 }
  0x5e   : > { %p1184_p0 = pneg %p1183_p11  ;;  %p1190_p13 = por %p1189_p4, %p1188_p7 }
  0x60   : > { %p1191_p6 = pnand %p1190_p13, %p1184_p0 }
  0x62   : > { %1194 = shalt.err (!%p1191_p6)
}
  0x63   : > { %s1661_s29 = smov 128   ;;  %349 = sbr.rel (%p1396_p8) target bundleno = 617 (0x269), region = 56 }
  0x64   : > { %1041 = dma.hbm_to_vmem [thread:$0]  (!%p1499_p2), %s1495_s9, 256, %s1503_s30, %s1505_s23, %s1661_s29, %s1661_s29, %s1286_s27  }
  0x65   : > { %s1539_s24 = sand.u32 (!%p1396_p8), 1, %s1265_s10   ;;  %p1662_p7 = scmp.ne.s32.totalorder (!%p1396_p8), %s1654_s18, 0 }
  0x66   : > { %s835_s17 = sshll.u32 (!%p1396_p8), %s1539_s24, 4  ;;  %s352_s14 = scalar_lea.sflag (!%p1396_p8), [#allocation4], %s1539_s24 }
  0x67   : > { %s1545_s26 = scalar_lea.vmem (!%p1396_p8), [#allocation3], %s835_s17 }
  0x6a   : > { %1248 = dma.done.wait (%p1662_p7), %s352_s14, 256  }
  0x6b   : > { %1250 = vsyncadd (%p1662_p7), %s352_s14, 4294967040  ;;  %p1663_p2 = scmp.ne.s32.totalorder %s1652_s16, 0 }
  0x6d   : > { %1252 = dma.done.wait (%p1663_p2), [#allocation7], 4096  }
  0x6e   : > { %1254 = vsyncadd (%p1663_p2), [#allocation7], 4294963200  ;;  %v1288_v0 = vmov 0   ;;  %v402_v1 = vld [vmem:[#allocation6] sm:$0xff]  ;;  %v403_v2 = vld [vmem:[#allocation6 + $0x8] sm:$0xff]  ;;  %v505_v59 = vlaneseq  ;;  %s397_s29 = scalar_lea.vmem [#allocation9], %s835_s17 }
  0x6f   : > { %1107 = vset.pattern.permute.xlu0 %v1288_v0  ;;  %1108 = vset.pattern.permute.xlu1 %v1288_v0  ;;  %v404_v3 = vld [vmem:[#allocation6 + $0x10] sm:$0xff]  ;;  %v955_v4 = vpack.c.bf16 %v403_v2, %v402_v1  ;;  %v405_v5 = vld [vmem:[#allocation6 + $0x18] sm:$0xff]  ;;  %v406_v7 = vld [vmem:[#allocation6 + $0x20] sm:$0xff]  ;;  %s719_s14 = sshll.u32 %s397_s29, 4  ;;  %s848_s18 = sshll.u32 %s1273_s12, 8  ;;  %s1578_s14 = int_to_ptr.vmem [resolvable:$true] %s719_s14 }
  0x70   : > { %v959_v6 = vpack.c.bf16 %v405_v5, %v404_v3  ;;  %v407_v8 = vld [vmem:[#allocation6 + $0x28] sm:$0xff]  ;;  %v408_v10 = vld [vmem:[#allocation6 + $0x30] sm:$0xff]  ;;  %v409_v12 = vld [vmem:[#allocation6 + $0x38] sm:$0xff]  ;;  %v506_v60 = vshrl.u32 %v505_v59, 7  ;;  %s1664_s9 = sld [smem:[#allocation15_spill]]  ;;  %s704_s17 = scalar_lea.sflag [#allocation5], %s1539_s24 }
  0x71   : > { %956 = vmatprep.subr.bf16.mxu0 %v955_v4  ;;  %v963_v9 = vpack.c.bf16 %v407_v8, %v406_v7  ;;  %v400_v11 = vld [vmem:[%s1545_s26] sm:$0xff]  ;;  %v502_v14 = vld [vmem:[%s1640_s8 + $0x8] sm:$0xff]  ;;  %v967_v17 = vpack.c.bf16 %v409_v12, %v408_v10  ;;  %v413_v26 = vld [vmem:[#allocation6 + $0x58] sm:$0xff]  ;;  %s1195_s23 = scalar_lea.vmem %s1578_s14, 256  ;;  %p1665_p12 = scmp.ne.s32.totalorder %s1659_s28, 0 }
  0x72   : > { %958 = vmatpush3.bf16.msra.mxu0 %v955_v4  ;;  %917 = vmatprep.mubr.f32.mxu0 %v400_v11  ;;  %v501_v13 = vld [vmem:[%s1640_s8] sm:$0xff]  ;;  %vm511_vm1 = vcmp.ge.s32.totalorder %v502_v14, 1  ;;  %vm541_vm3 = vcmp.ge.s32.totalorder %v502_v14, 2  ;;  %v411_v19 = vld [vmem:[#allocation6 + $0x48] sm:$0xff]  ;;  %vm571_vm5 = vcmp.ge.s32.totalorder %v502_v14, 4  ;;  %v412_v25 = vld [vmem:[#allocation6 + $0x50] sm:$0xff]  ;;  %p1196_p8 = scmp.ne.s32.totalorder %s1578_s14, %s1195_s23 }
  0x73   : > { %960 = vmatprep.subr.bf16.mxu0 %v959_v6  ;;  %vm510_vm0 = vcmp.ge.s32.totalorder %v501_v13, 1  ;;  %vm540_vm2 = vcmp.ge.s32.totalorder %v501_v13, 2  ;;  %v410_v18 = vld [vmem:[#allocation6 + $0x40] sm:$0xff]  ;;  %v513_v20 = vsel %vm511_vm1, 1, %v1288_v0  ;;  %vm570_vm4 = vcmp.ge.s32.totalorder %v501_v13, 4  ;;  %v604_v24 = vld [vmem:[#allocation8 + $0x8] sm:$0xff] }
  0x74   : > { %v512_v15 = vsel %vm510_vm0, 1, %v1288_v0  ;;  %v542_v16 = vsel %vm540_vm2, 1, %v1288_v0  ;;  %v543_v21 = vsel %vm541_vm3, 1, %v1288_v0  ;;  %v971_v22 = vpack.c.bf16 %v411_v19, %v410_v18  ;;  %v603_v23 = vld [vmem:[#allocation8] sm:$0xff]  ;;  %v415_v32 = vld [vmem:[#allocation6 + $0x68] sm:$0xff]  ;;  %v416_v34 = vld [vmem:[#allocation6 + $0x70] sm:$0xff]  ;;  %p1197_p1 = pnand %p1196_p8, %p1665_p12 }
  0x75   : > { %515 = vperm.xlu0 %1107, %v512_v15   ;;  %545 = vperm.xlu1 %1108, %v542_v16   ;;  %v572_v27 = vsel %vm570_vm4, 1, %v1288_v0  ;;  %v987_v28 = vpack.c.bf16 %v604_v24, %v603_v23  ;;  %v573_v29 = vsel %vm571_vm5, 1, %v1288_v0  ;;  %v975_v30 = vpack.c.bf16 %v413_v26, %v412_v25  ;;  %v414_v31 = vld [vmem:[#allocation6 + $0x60] sm:$0xff]  ;;  %v417_v35 = vld [vmem:[#allocation6 + $0x78] sm:$0xff]  ;;  %v605_v38 = vld [vmem:[#allocation8 + $0x10] sm:$0xff]  ;;  %s1289_s12 = smov [#allocation9]  }
  0x76   : > { %962 = vmatpush3.bf16.msra.mxu0 %v959_v6  ;;  %v979_v33 = vpack.c.bf16 %v415_v32, %v414_v31  ;;  %v983_v36 = vpack.c.bf16 %v417_v35, %v416_v34  ;;  %v401_v37 = vld [vmem:[%s1545_s26 + $0x8] sm:$0xff]  ;;  %v607_v41 = vld [vmem:[#allocation8 + $0x20] sm:$0xff]  ;;  %v609_v44 = vld [vmem:[#allocation8 + $0x30] sm:$0xff]  ;;  %v527_v0 = vsub.s32 0, %v506_v60  ;;  %vm507_vm6 = vcmp.lt.s32.totalorder %v506_v60, 1  ;;  %s1583_s30 = scalar_lea.hbm %s1664_s9, %s848_s18  ;;  %p1198_p10 = pneg %p1197_p1 }
  0x77   : > { %964 = vmatprep.subr.bf16.mxu0 %v963_v9  ;;  %988 = vmatprep.subr.bf16.mxu1 %v987_v28  ;;  %v606_v39 = vld [vmem:[#allocation8 + $0x18] sm:$0xff]  ;;  %v608_v42 = vld [vmem:[#allocation8 + $0x28] sm:$0xff]  ;;  %v611_v47 = vld [vmem:[#allocation8 + $0x40] sm:$0xff]  ;;  %vm537_vm9 = vcmp.lt.s32.totalorder %v506_v60, 2  ;;  %vm567_vm12 = vcmp.lt.s32.totalorder %v506_v60, 4  ;;  %s1199_s25 = sshll.u32 %s1289_s12, 4  ;;  %s1200_s25 = int_to_ptr.vmem [resolvable:$false] %s1199_s25 }
  0x78   : > { %990 = vmatpush3.bf16.msra.mxu1 %v987_v28  ;;  %v991_v40 = vpack.c.bf16 %v606_v39, %v605_v38  ;;  %v995_v43 = vpack.c.bf16 %v608_v42, %v607_v41  ;;  %v610_v45 = vld [vmem:[#allocation8 + $0x38] sm:$0xff]  ;;  %v612_v48 = vld [vmem:[#allocation8 + $0x48] sm:$0xff]  ;;  %v613_v50 = vld [vmem:[#allocation8 + $0x50] sm:$0xff]  ;;  %s1201_s15 = scalar_lea.vmem %s1200_s25, 512  ;;  %p1202_p3 = scmp.lt.s32.totalorder %s1578_s14, %s1200_s25 }
  0x79   : > { %518 = vperm.xlu0 %1107, %v513_v20   ;;  %548 = vperm.xlu1 %1108, %v543_v21   ;;  %v999_v46 = vpack.c.bf16 %v610_v45, %v609_v44  ;;  %v1003_v49 = vpack.c.bf16 %v612_v48, %v611_v47  ;;  %v614_v51 = vld [vmem:[#allocation8 + $0x58] sm:$0xff]  ;;  %v615_v53 = vld [vmem:[#allocation8 + $0x60] sm:$0xff]  ;;  %v616_v54 = vld [vmem:[#allocation8 + $0x68] sm:$0xff]  ;;  %p1203_p5 = scmp.lt.s32.totalorder %s1201_s15, %s1195_s23 }
  0x7a   : > { %966 = vmatpush3.bf16.msra.mxu0 %v963_v9  ;;  %992 = vmatprep.subr.bf16.mxu1 %v991_v40  ;;  %v1007_v52 = vpack.c.bf16 %v614_v51, %v613_v50  ;;  %v1011_v55 = vpack.c.bf16 %v616_v54, %v615_v53  ;;  %v617_v56 = vld [vmem:[#allocation8 + $0x70] sm:$0xff]  ;;  %v618_v57 = vld [vmem:[#allocation8 + $0x78] sm:$0xff]  ;;  %v839_v61 = vld [vmem:[%s1634_s2] ss:$0 sm:$0xff] }
  0x7b   : > { %968 = vmatprep.subr.bf16.mxu0 %v967_v17  ;;  %v1015_v58 = vpack.c.bf16 %v618_v57, %v617_v56  ;;  %v500_v3 = vld [vmem:[%s1637_s5] sm:$0x1]  ;;  %p1204_p9 = por %p1203_p5, %p1202_p3 }
  0x7c   : > { %994 = vmatpush3.bf16.msra.mxu1 %v991_v40  ;;  %v528_v7 = vrot.slane %v500_v3, %v527_v0  ;;  %v534_v16 = vmul.f32 %v500_v3, %v500_v3  ;;  %v841_v48 = vld [vmem:[%s1636_s4] ss:$0 sm:$0xff] }
  0x7d   : > { %575 = vperm.xlu0 %1107, %v572_v27   ;;  %578 = vperm.xlu1 %1108, %v573_v29   ;;  %p1205_p11 = pnand %p1204_p9, %p1198_p10 }
  0x7e   : > { %970 = vmatpush3.bf16.msra.mxu0 %v967_v17  ;;  %996 = vmatprep.subr.bf16.mxu1 %v995_v43  ;;  %v558_v21 = vrot.slane %v534_v16, %v527_v0  ;;  %v564_v29 = vmul.f32 %v534_v16, %v534_v16 }
  0x7f   : > { %972 = vmatprep.subr.bf16.mxu0 %v971_v22 }
  0x80   : > { %998 = vmatpush3.bf16.msra.mxu1 %v995_v43  ;;  %v840_v43 = vld [vmem:[%s1638_s6] ss:$0 sm:$0xff] }
  0x81   : > { %1000 = vmatprep.subr.bf16.mxu1 %v999_v46 }
  0x82   : > { %974 = vmatpush3.bf16.msra.mxu0 %v971_v22 }
  0x83   : > { %976 = vmatprep.subr.bf16.mxu0 %v975_v30 }
  0x84   : > { %1002 = vmatpush3.bf16.msra.mxu1 %v999_v46 }
  0x85   : > { %1004 = vmatprep.subr.bf16.mxu1 %v1003_v49 }
  0x86   : > { %978 = vmatpush3.bf16.msra.mxu0 %v975_v30 }
  0x87   : > { %980 = vmatprep.subr.bf16.mxu0 %v979_v33 }
  0x88   : > { %1006 = vmatpush3.bf16.msra.mxu1 %v1003_v49 }
  0x89   : > { %1008 = vmatprep.subr.bf16.mxu1 %v1007_v52 }
  0x8a   : > { %982 = vmatpush3.bf16.msra.mxu0 %v979_v33 }
  0x8b   : > { %984 = vmatprep.subr.bf16.mxu0 %v983_v36 }
  0x8c   : > { %1010 = vmatpush3.bf16.msra.mxu1 %v1007_v52 }
  0x8d   : > { %1012 = vmatprep.subr.bf16.mxu1 %v1011_v55 }
  0x8e   : > { %986 = vmatpush3.bf16.msra.mxu0 %v983_v36  ;;  %v588_v36 = vrot.slane %v564_v29, %v527_v0 }
  0x90   : > { %1014 = vmatpush3.bf16.msra.mxu1 %v1011_v55 }
  0x91   : > { %918 = vmatmul.mubr.f32.vlgmr.msra.gmra.mrb[0].mxu0 %v401_v37  ;;  %1016 = vmatprep.subr.bf16.mxu1 %v1015_v58 }
  0x94   : > { %1018 = vmatpush3.bf16.msra.mxu1 %v1015_v58 }
  0xf4   : > { %v516_v62 = vpop.permute.xlu0 %515  ;;  %v546_v11 = vpop.permute.xlu1 %545 }
  0xf5   : > { %vm520_vm7 = vcmp.eq.s32.totalorder %v516_v62, 1  ;;  %vm550_vm10 = vcmp.eq.s32.totalorder %v546_v11, 1 }
  0xf8   : > { %v519_v8 = vpop.permute.xlu0 %518  ;;  %v549_v22 = vpop.permute.xlu1 %548 }
  0xf9   : > { %vm521_vm8 = vcmp.eq.s32.totalorder %v519_v8, 1  ;;  %vm551_vm11 = vcmp.eq.s32.totalorder %v549_v22, 1 }
  0xfc   : > { %v576_v32 = vpop.permute.xlu0 %575  ;;  %v579_v33 = vpop.permute.xlu1 %578 }
  0xfd   : > { %vm580_vm13 = vcmp.eq.s32.totalorder %v576_v32, 1  ;;  %vm581_vm14 = vcmp.eq.s32.totalorder %v579_v33, 1 }
 0x164   : > { %v919_v63 = vpop.f32.mrb[0].mxu0 }
 0x165   : > { %v497_v1 = vadd.f32 %v919_v63, %v839_v61  ;;  %v491_v2 = vpop.f32.mrb[1].mxu0 }
 0x166   : > { %v492_v4 = vadd.f32 %v839_v61, %v491_v2 }
 0x167   : > { %v504_v5 = vrot.slane %v497_v1, 7 }
 0x168   : > { %v503_v6 = vrot.slane %v492_v4, 7 }
 0x16a   : > { %v508_v9 = vsel %vm507_vm6, %v503_v6, %v504_v5  ;;  %v509_v10 = vsel %vm507_vm6, %v504_v5, %v503_v6 }
 0x16b   : > { %v522_v12 = vsel %vm520_vm7, %v509_v10, 0.0  ;;  %v523_v13 = vsel %vm521_vm8, %v508_v9, 0.0 }
 0x16c   : > { %v530_v14 = vmul.f32 %v528_v7, %v522_v12  ;;  %v531_v15 = vmul.f32 %v528_v7, %v523_v13 }
 0x16e   : > { %v532_v17 = vadd.f32 %v530_v14, %v492_v4  ;;  %v533_v18 = vadd.f32 %v531_v15, %v497_v1 }
 0x170   : > { %v535_v19 = vrot.slane %v532_v17, 6  ;;  %v536_v20 = vrot.slane %v533_v18, 6 }
 0x172   : > { %v539_v23 = vsel %vm537_vm9, %v536_v20, %v535_v19  ;;  %v538_v24 = vsel %vm537_vm9, %v535_v19, %v536_v20 }
 0x173   : > { %v552_v25 = vsel %vm550_vm10, %v539_v23, 0.0  ;;  %v553_v26 = vsel %vm551_vm11, %v538_v24, 0.0 }
 0x174   : > { %v560_v27 = vmul.f32 %v558_v21, %v552_v25  ;;  %v561_v28 = vmul.f32 %v558_v21, %v553_v26 }
 0x176   : > { %v562_v30 = vadd.f32 %v560_v27, %v532_v17  ;;  %v563_v31 = vadd.f32 %v561_v28, %v533_v18 }
 0x178   : > { %v565_v34 = vrot.slane %v562_v30, 4  ;;  %v566_v35 = vrot.slane %v563_v31, 4 }
 0x17a   : > { %v568_v37 = vsel %vm567_vm12, %v565_v34, %v566_v35  ;;  %v569_v38 = vsel %vm567_vm12, %v566_v35, %v565_v34 }
 0x17b   : > { %v583_v39 = vsel %vm581_vm14, %v568_v37, 0.0  ;;  %v582_v40 = vsel %vm580_vm13, %v569_v38, 0.0 }
 0x17c   : > { %v591_v41 = vmul.f32 %v588_v36, %v583_v39  ;;  %v590_v42 = vmul.f32 %v588_v36, %v582_v40 }
 0x17e   : > { %v593_v44 = vadd.f32 %v591_v41, %v563_v31  ;;  %v592_v45 = vadd.f32 %v590_v42, %v562_v30 }
 0x180   : > { %v601_v46 = vmul.f32 %v840_v43, %v592_v45  ;;  %v602_v47 = vmul.f32 %v840_v43, %v593_v44 }
 0x182   : > { %952 = vmatprep.mubr.f32.mxu1 %v601_v46 }
 0x183   : > { %953 = vmatmul.mubr.f32.vlgmr.msra.gmra.mrb[0].mxu1 %v602_v47 }
 0x256   : > { %v954_v49 = vpop.f32.mrb[0].mxu1 }
 0x257   : > { %v698_v50 = vadd.f32 %v954_v49, %v841_v48  ;;  %v692_v51 = vpop.f32.mrb[1].mxu1 }
 0x258   : > { %v693_v52 = vadd.f32 %v841_v48, %v692_v51 }
 0x259   : > { %702 = vst [vmem:[%s397_s29 + $0x8] sm:$0xff] %v698_v50 }
 0x25a   : > { %701 = vst [vmem:[%s397_s29] sm:$0xff] %v693_v52 }
 0x25b   : > { %1208 = shalt.err (!%p1205_p11)
}
 0x25c   : > { %s1209_s22 = scalar_lea.hbm %s1583_s30, 256  ;;  %s1213_s16 = scalar_lea.hbm %s1664_s9, 512 }
 0x25d   : > { %p1210_p0 = scmp.ne.s32.totalorder %s1583_s30, %s1209_s22  ;;  %p1214_p6 = scmp.lt.u32.totalorder %s1583_s30, %s1664_s9 }
 0x25e   : > { %p1215_p7 = scmp.lt.u32.totalorder %s1213_s16, %s1209_s22  ;;  %p1217_p8 = scmp.lt.u32.totalorder %s1209_s22, %s1583_s30 }
 0x25f   : > { %p1211_p4 = pnand %p1210_p0, %p1665_p12 }
 0x260   : > { %p1216_p2 = por %p1215_p7, %p1214_p6 }
 0x261   : > { %p1212_p13 = pneg %p1211_p4 }
 0x262   : > { %p1218_p1 = por %p1217_p8, %p1216_p2 }
 0x264   : > { %p1219_p10 = pnand %p1218_p1, %p1212_p13 }
 0x266   : > { %1222 = shalt.err (!%p1219_p10)
}
 0x267   : > { %s1290_s27 = smov 128   ;;  %s1291_s23 = smov 8  }
 0x268   : > { %1029 = dma.vmem_to_hbm [thread:$0]  (%p1665_p12), %s1578_s14, 256, %s1583_s30, %s704_s17, %s1290_s27, %s1290_s27, %s1291_s23  }
 0x269 PF: > { %s1666_s12 = sld [smem:[#allocation13_spill]]  ;;  %s1667_s25 = sld [smem:[#allocation14_spill]] }
 0x26a   : > { %p1669_p5 = scmp.ge.s32.totalorder %s1281_s13, 2 }
 0x26f   : > { %s734_s15 = sand.u32 1, %s1666_s12   ;;  %p1668_p3 = scmp.ne.s32.totalorder %s1667_s25, 0 }
 0x270   : > { %s735_s22 = scalar_lea.sflag [#allocation5], %s734_s15 }
 0x271   : > { %p1043_p9 = pnand %p1669_p5, %p1668_p3 }
 0x273   : > { %1256 = dma.done.wait (!%p1043_p9), %s735_s22, 256  }
 0x274   : > { %1258 = vsyncadd (!%p1043_p9), %s735_s22, 4294967040  ;;  %s26_s13 = sadd.s32 1, %s1281_s13   ;;  %s1670_s30 = smov %s1265_s10 }
 0x275   : > { %p23_p11 = scmp.ge.s32.totalorder %s26_s13, 4   ;;  %s1671_s10 = smov %s1269_s11 }
 0x276   : > { %s1672_s11 = smov %s1490_s21  ;;  %s1673_s12 = smov %s1277_s7 }
 0x277   : > { %s1674_s7 = smov %s1676_s19  ;;  %25 = sbr.rel (!%p23_p11) target bundleno = 9 (0x9), region = 109 }
 0x27e   :  { %740 = vsyncpa [#allocation4], 1 }
 0x27f   :  { %742 = vsyncpa [#allocation4 + $0x1], 1 }
 0x280   :  { %743 = vsyncpa [#allocation7], 1 }
 0x281   :  { %744 = vsyncpa [#allocation5], 1 }
 0x282   :  { %746 = vsyncpa [#allocation5 + $0x1], 1 }

</bundles_post_ra>
